<compile_context>
chip_gen: v6e
topology: v6e:2x2x1
jax: 0.10.0
libtpu: 0.0.40
codegen_flags: <defaults>
</compile_context>

<pallas_src>
import functools

import jax
import jax.numpy as jnp
from jax.experimental import pallas as pl
from jax.experimental.pallas import tpu as pltpu


OUT_PAD = 128     # lane-dense classifier width (>= num_classes, multiple of 128)
TB_MAX = 2048     # max batch tile: 2 * (2048*784*4) ~ 12.25 MiB double-buffered
                  # f32 x tiles + ~1 MiB bf16 out tiles, well under v7x scoped VMEM.


# ---------------------------------------------------------------------------
# Kernel
# ---------------------------------------------------------------------------
def mlp_kernel(x_ref, w1_ref, b1_ref, w2_ref, b2_ref, o_ref):
    # x_ref:  (TB, 784)      f32  (native dtype; cast to bf16 here, in VMEM)
    # w1_ref: (784, 128)     bf16
    # b1_ref: (1, 128)       f32
    # w2_ref: (128, OUT_PAD) bf16 (zero-padded columns beyond num_classes)
    # b2_ref: (1, OUT_PAD)   f32
    # o_ref:  (TB, OUT_PAD)  bf16
    x = x_ref[...].astype(jnp.bfloat16)
    h = jnp.dot(x, w1_ref[...], preferred_element_type=jnp.float32)    # (TB, 128) f32
    h = jnp.maximum(h + b1_ref[...], 0.0)                              # bias + ReLU
    y = jnp.dot(h.astype(jnp.bfloat16), w2_ref[...],
                preferred_element_type=jnp.float32)                    # (TB, OUT_PAD) f32
    o_ref[...] = (y + b2_ref[...]).astype(o_ref.dtype)                 # bf16 store


# ---------------------------------------------------------------------------
# One-time parameter preparation (hoisted out of the per-call forward path)
# ---------------------------------------------------------------------------
def prepare_params(w1, b1, w2, b2):
    """Pre-transpose to (in, out), cast weights to bf16, pad classifier to 128."""
    hidden_size, input_size = w1.shape
    num_classes = w2.shape[0]

    w1_t = jnp.asarray(w1, jnp.float32).T.astype(jnp.bfloat16)            # (784, 128)
    b1_2d = jnp.asarray(b1, jnp.float32).reshape(1, hidden_size)          # (1, 128)

    w2_t = jnp.zeros((hidden_size, OUT_PAD), jnp.bfloat16)
    w2_t = w2_t.at[:, :num_classes].set(
        jnp.asarray(w2, jnp.float32).T.astype(jnp.bfloat16))              # (128, 128)
    b2_2d = jnp.zeros((1, OUT_PAD), jnp.float32)
    b2_2d = b2_2d.at[:, :num_classes].set(jnp.asarray(b2, jnp.float32))   # (1, 128)

    return w1_t, b1_2d, w2_t, b2_2d, num_classes


def _round_up(x, m):
    return ((x + m - 1) // m) * m


def _pick_batch_tile(batch):
    """Batch tile: multiple of 8 sublanes, >=2 grid steps when possible (v7x
    megacore), capped at TB_MAX so the double-buffered f32 x tile fits VMEM."""
    if batch <= 8:
        return 8
    half = _round_up(pl.cdiv(batch, 2), 8)
    return min(TB_MAX, half)


# ---------------------------------------------------------------------------
# Forward pass
# ---------------------------------------------------------------------------
@functools.partial(jax.jit, static_argnames=("num_classes",))
def mnist_classifier_forward(x_nchw, w1_t, b1_2d, w2_t, b2_2d, *, num_classes=10):
    """Forward pass matching the PyTorch module.

    Args:
      x_nchw: (B, 1, 28, 28) float array (native dtype; no wrapper-side cast).
      w1_t, b1_2d, w2_t, b2_2d: output of prepare_params().
      num_classes: static number of valid classifier lanes.
    Returns:
      logits: (B, num_classes) bfloat16.
    """
    input_size, hidden_size = w1_t.shape
    B = x_nchw.shape[0]

    # torch x.view(B, -1): pure metadata reshape, keeps native dtype.
    x2d = x_nchw.reshape(B, input_size)

    tb = _pick_batch_tile(B)
    grid = (pl.cdiv(B, tb),)   # ragged last block handled by Pallas (writes masked)

    cost = pl.CostEstimate(
        flops=2 * B * (input_size * hidden_size + hidden_size * OUT_PAD),
        transcendentals=0,
        bytes_accessed=(x2d.size * x2d.dtype.itemsize        # activations in (f32, read once)
                        + w1_t.size * 2 + w2_t.size * 2      # bf16 weights
                        + b1_2d.size * 4 + b2_2d.size * 4    # f32 biases
                        + B * OUT_PAD * 2),                  # bf16 logits out
    )

    out = pl.pallas_call(
        mlp_kernel,
        out_shape=jax.ShapeDtypeStruct((B, OUT_PAD), jnp.bfloat16),
        grid=grid,
        in_specs=[
            pl.BlockSpec((tb, input_size), lambda i: (i, 0)),           # x tile
            pl.BlockSpec((input_size, hidden_size), lambda i: (0, 0)),  # w1.T (resident)
            pl.BlockSpec((1, hidden_size), lambda i: (0, 0)),           # b1
            pl.BlockSpec((hidden_size, OUT_PAD), lambda i: (0, 0)),     # w2.T padded
            pl.BlockSpec((1, OUT_PAD), lambda i: (0, 0)),               # b2 padded
        ],
        out_specs=pl.BlockSpec((tb, OUT_PAD), lambda i: (i, 0)),
        compiler_params=pltpu.CompilerParams(
            dimension_semantics=("parallel",),
        ),
        cost_estimate=cost,
    )(x2d, w1_t, b1_2d, w2_t, b2_2d)

    # Lanes [num_classes:OUT_PAD] are exactly zero; under jit this slice fuses
    # with the consumer rather than materializing a separate HBM pass.
    return out[:, :num_classes]


# ---------------------------------------------------------------------------
# Self-test
# ---------------------------------------------------------------------------
if __name__ == "__main__":
    input_size = 28 * 28
    hidden_size = 128
    num_classes = 10
    batch = 2

    key = jax.random.PRNGKey(0)
    kx, kw1, kb1, kw2, kb2 = jax.random.split(key, 5)

    x = jax.random.normal(kx, (batch, 1, 28, 28), dtype=jnp.float32)

    # Match nn.Linear's U(-1/sqrt(fan_in), 1/sqrt(fan_in)) init deterministically.
    lim1 = 1.0 / jnp.sqrt(jnp.float32(input_size))
    w1 = jax.random.uniform(kw1, (hidden_size, input_size), jnp.float32, -lim1, lim1)
    b1 = jax.random.uniform(kb1, (hidden_size,), jnp.float32, -lim1, lim1)
    lim2 = 1.0 / jnp.sqrt(jnp.float32(hidden_size))
    w2 = jax.random.uniform(kw2, (num_classes, hidden_size), jnp.float32, -lim2, lim2)
    b2 = jax.random.uniform(kb2, (num_classes,), jnp.float32, -lim2, lim2)

    # One-time prep, outside the hot path.
    w1_t, b1_2d, w2_t, b2_2d, nc = prepare_params(w1, b1, w2, b2)

    logits = mnist_classifier_forward(x, w1_t, b1_2d, w2_t, b2_2d, num_classes=nc)
    jax.block_until_ready(logits)

    # Pure-JAX f32 reference (tolerance loosened: bf16 inputs/weights/output,
    # f32 accumulation inside the kernel).
    ref = jnp.maximum(x.reshape(batch, -1) @ w1.T + b1, 0.0) @ w2.T + b2
    assert logits.shape == (batch, num_classes)
    err = jnp.max(jnp.abs(logits.astype(jnp.float32) - ref))
    assert jnp.allclose(logits.astype(jnp.float32), ref, atol=3e-2, rtol=3e-2), (
        f"max abs err {err}")

    print("KERNEL_OK")
</pallas_src>

<mosaic_0001>
module attributes {stable_mosaic.version = 11 : i64} {
  func.func @mlp_kernel(%arg0: i32, %arg1: memref<8x784xf32, #tpu.memory_space<vmem>>, %arg2: memref<784x128xbf16, #tpu.memory_space<vmem>>, %arg3: memref<1x128xf32, #tpu.memory_space<vmem>>, %arg4: memref<128x128xbf16, #tpu.memory_space<vmem>>, %arg5: memref<1x128xf32, #tpu.memory_space<vmem>>, %arg6: memref<8x128xbf16, #tpu.memory_space<vmem>>) attributes {dimension_semantics = [#tpu.dimension_semantics<parallel>], iteration_bounds = array<i64: 1>, scalar_prefetch = 0 : i64, scratch_operands = 0 : i64, tpu.core_type = #tpu.core_type<tc>, window_params = [{transform_indices = @transform_0, window_bounds = array<i64: 8, 784>}, {pipeline_mode = #tpu.pipeline_mode<synchronous>, transform_indices = @transform_1, window_bounds = array<i64: 784, 128>}, {pipeline_mode = #tpu.pipeline_mode<synchronous>, transform_indices = @transform_2, window_bounds = array<i64: 1, 128>}, {pipeline_mode = #tpu.pipeline_mode<synchronous>, transform_indices = @transform_3, window_bounds = array<i64: 128, 128>}, {pipeline_mode = #tpu.pipeline_mode<synchronous>, transform_indices = @transform_4, window_bounds = array<i64: 1, 128>}, {transform_indices = @transform_5, window_bounds = array<i64: 8, 128>}]} {
    %c0 = arith.constant 0 : index
    %c0_0 = arith.constant 0 : index
    %0 = vector.load %arg1[%c0, %c0_0] : memref<8x784xf32, #tpu.memory_space<vmem>>, vector<8x784xf32>
    %1 = arith.truncf %0 : vector<8x784xf32> to vector<8x784xbf16>
    %c0_1 = arith.constant 0 : index
    %c0_2 = arith.constant 0 : index
    %2 = vector.load %arg2[%c0_1, %c0_2] : memref<784x128xbf16, #tpu.memory_space<vmem>>, vector<784x128xbf16>
    %cst = arith.constant dense<0.000000e+00> : vector<8x128xf32>
    %3 = tpu.matmul %1, %2, %cst {dimension_numbers = #tpu.dot_dimension_numbers<[1], [0], [0], [1], [0, 0, 1, 1], [], []>} : vector<8x784xbf16>, vector<784x128xbf16>, vector<8x128xf32> -> vector<8x128xf32>
    %c0_3 = arith.constant 0 : index
    %c0_4 = arith.constant 0 : index
    %4 = vector.load %arg3[%c0_3, %c0_4] : memref<1x128xf32, #tpu.memory_space<vmem>>, vector<1x128xf32>
    %5 = vector.broadcast %4 : vector<1x128xf32> to vector<8x128xf32>
    %6 = arith.addf %3, %5 : vector<8x128xf32>
    %cst_5 = arith.constant 0.000000e+00 : f32
    %7 = vector.broadcast %cst_5 : f32 to vector<8x128xf32>
    %8 = arith.maximumf %6, %7 : vector<8x128xf32>
    %9 = arith.truncf %8 : vector<8x128xf32> to vector<8x128xbf16>
    %c0_6 = arith.constant 0 : index
    %c0_7 = arith.constant 0 : index
    %10 = vector.load %arg4[%c0_6, %c0_7] : memref<128x128xbf16, #tpu.memory_space<vmem>>, vector<128x128xbf16>
    %cst_8 = arith.constant dense<0.000000e+00> : vector<8x128xf32>
    %11 = tpu.matmul %9, %10, %cst_8 {dimension_numbers = #tpu.dot_dimension_numbers<[1], [0], [0], [1], [0, 0, 1, 1], [], []>} : vector<8x128xbf16>, vector<128x128xbf16>, vector<8x128xf32> -> vector<8x128xf32>
    %c0_9 = arith.constant 0 : index
    %c0_10 = arith.constant 0 : index
    %12 = vector.load %arg5[%c0_9, %c0_10] : memref<1x128xf32, #tpu.memory_space<vmem>>, vector<1x128xf32>
    %13 = vector.broadcast %12 : vector<1x128xf32> to vector<8x128xf32>
    %14 = arith.addf %11, %13 : vector<8x128xf32>
    %15 = arith.truncf %14 : vector<8x128xf32> to vector<8x128xbf16>
    %c0_11 = arith.constant 0 : index
    %c0_12 = arith.constant 0 : index
    %16 = vector.load %arg6[%c0_11, %c0_12] : memref<8x128xbf16, #tpu.memory_space<vmem>>, vector<8x128xbf16>
    tpu.vector_store %arg6[%c0_11, %c0_12], %15 {strides = array<i32>} : memref<8x128xbf16, #tpu.memory_space<vmem>>, vector<8x128xbf16>,
    return
  }
  func.func @transform_0(%arg0: i32) -> (i32, i32) {
    %c0_i32 = arith.constant 0 : i32
    %c0_i32_0 = arith.constant 0 : i32
    return %arg0, %c0_i32 : i32, i32
  }
  func.func @transform_1(%arg0: i32) -> (i32, i32) {
    %c0_i32 = arith.constant 0 : i32
    %c0_i32_0 = arith.constant 0 : i32
    %c0_i32_1 = arith.constant 0 : i32
    return %c0_i32, %c0_i32_0 : i32, i32
  }
  func.func @transform_2(%arg0: i32) -> (i32, i32) {
    %c0_i32 = arith.constant 0 : i32
    %c0_i32_0 = arith.constant 0 : i32
    %c0_i32_1 = arith.constant 0 : i32
    return %c0_i32, %c0_i32_0 : i32, i32
  }
  func.func @transform_3(%arg0: i32) -> (i32, i32) {
    %c0_i32 = arith.constant 0 : i32
    %c0_i32_0 = arith.constant 0 : i32
    %c0_i32_1 = arith.constant 0 : i32
    return %c0_i32, %c0_i32_0 : i32, i32
  }
  func.func @transform_4(%arg0: i32) -> (i32, i32) {
    %c0_i32 = arith.constant 0 : i32
    %c0_i32_0 = arith.constant 0 : i32
    %c0_i32_1 = arith.constant 0 : i32
    return %c0_i32, %c0_i32_0 : i32, i32
  }
  func.func @transform_5(%arg0: i32) -> (i32, i32) {
    %c0_i32 = arith.constant 0 : i32
    %c0_i32_0 = arith.constant 0 : i32
    return %arg0, %c0_i32 : i32, i32
  }
}

</mosaic_0001>

<bundles_post_ra>
// kernel: mnist_classifier_forward.1
= control target key start
LH: loop header
LB: loop body
LE: loop exit
PB: predicated region body
PF: predicated region fallthrough
CT: control target
= control target key end

     0   :  { %10 = vsyncpa [#allocation3], 0  ;;  %s1279_s0 = inlined_call_operand.vmem [shape: f32[2,784], index: 0, kind: input, shape index: {}]   ;;  %s1280_s1 = inlined_call_operand.hbm [shape: bf16[784,128], index: 1, kind: input, shape index: {}]   ;;  %s1281_s2 = inlined_call_operand.vmem [shape: f32[1,128], index: 2, kind: input, shape index: {}]   ;;  %s1282_s3 = inlined_call_operand.vmem [shape: bf16[128,128], index: 3, kind: input, shape index: {}]   ;;  %s1283_s4 = inlined_call_operand.vmem [shape: f32[1,128], index: 4, kind: input, shape index: {}]   ;;  %s1284_s5 = inlined_call_operand.hbm [shape: bf16[2,128], index: 5, kind: output, shape index: {}]  }
   0x1   :  { %11 = vsyncpa [#allocation4], 0  ;;  %s1152_s18 = smov [#allocation2]  }
   0x2   :  { %s19_s19 = sshll.u32 %s1152_s18, 4  ;;  %s20_s19 = int_to_ptr.vmem [resolvable:$true] %s19_s19 }
   0x3   :  { %s1116_s20 = scalar_lea.vmem %s20_s19, 6272  ;;  %p1121_p1 = scmp.lt.s32.totalorder %s20_s19, %s20_s19 }
   0x4   :  { %p1117_p0 = scmp.ne.s32.totalorder %s20_s19, %s1116_s20  ;;  %p1122_p2 = scmp.lt.s32.totalorder %s1116_s20, %s1116_s20 }
   0x6   :  { %p1123_p3 = por %p1122_p2, %p1121_p1 }
   0x8   :  { %p1124_p4 = pnand %p1123_p3, %p1117_p0 }
   0xa   :  { %1127 = shalt.err (!%p1124_p4)
}
   0xb   :  { %s1153_s21 = smov 64   ;;  %s1154_s22 = smov 4  }
   0xc   :  { %25 = dma.hbm_to_vmem [thread:$0]  %s1280_s1, 6272, %s20_s19, [#allocation3], %s1153_s21, %s1153_s21, %s1154_s22  }
   0xd   :  { %1148 = dma.done.wait [#allocation3], 6272  }
   0xe   :  { %1149 = vsyncadd [#allocation3], 4294961024  ;;  %v1039_v0 = vld [vmem:[#allocation2 + $0x78] sm:$0xff]   ;;  %v1043_v4 = vld [vmem:[#allocation2 + $0x70] sm:$0xff]   ;;  %v1155_v23 = vmov 1983009808   ;;  %v59_v25 = vlaneseq }
   0xf   :  { %v1040_v1 = vld [vmem:[#allocation2 + $0x38] sm:$0xff]   ;;  %926 = vmatprep.subr.bf16.mxu0 %v1039_v0  ;;  %v1044_v5 = vld [vmem:[#allocation2 + $0x30] sm:$0xff]   ;;  %v1047_v8 = vld [vmem:[#allocation2 + $0x68] sm:$0xff]   ;;  %v57_v24 = vunpack.c.l.s4 %v1155_v23  ;;  %v1156_v47 = vmov 0.0   ;;  %vm1157_vm0 = vmmov 0   ;;  %vm536_vm1 = vcmask 130048  }
  0x10   :  { %v1041_v2 = vld [vmem:[#allocation2 + $0xf8] sm:$0xff]   ;;  %927 = vmatpush3.bf16.msra.mxu0 %v1040_v1  ;;  %v1045_v6 = vld [vmem:[#allocation2 + $0xf0] sm:$0xff]   ;;  %v1048_v9 = vld [vmem:[#allocation2 + $0x28] sm:$0xff]   ;;  %v1195_v31 = vshrl.u32 %v59_v25, 7 }
  0x11   :  { %v1042_v3 = vld [vmem:[#allocation2 + $0xb8] sm:$0xff]   ;;  %948 = vmatprep.subr.bf16.mxu1 %v1041_v2  ;;  %928 = vmatprep.subr.bf16.mxu0 %v1043_v4  ;;  %v1046_v7 = vld [vmem:[#allocation2 + $0xb0] sm:$0xff]   ;;  %v1049_v10 = vld [vmem:[#allocation2 + $0xe8] sm:$0xff]   ;;  %v58_v30 = vunpack.c.0.s8 %v57_v24 }
  0x12   :  { %949 = vmatpush3.bf16.msra.mxu1 %v1042_v3  ;;  %v1050_v11 = vld [vmem:[#allocation2 + $0xa8] sm:$0xff]   ;;  %v1051_v12 = vld [vmem:[#allocation2 + $0x60] sm:$0xff]   ;;  %v1055_v16 = vld [vmem:[#allocation2 + $0x58] sm:$0xff]  }
  0x13   :  { %950 = vmatprep.subr.bf16.mxu1 %v1045_v6  ;;  %v1052_v13 = vld [vmem:[#allocation2 + $0x20] sm:$0xff]   ;;  %v1056_v17 = vld [vmem:[#allocation2 + $0x18] sm:$0xff]   ;;  %v1059_v20 = vld [vmem:[#allocation2 + $0x50] sm:$0xff]   ;;  %v1198_v36 = vsub.s32 %v58_v30, %v1195_v31 }
  0x14   :  { %929 = vmatpush3.bf16.msra.mxu0 %v1044_v5  ;;  %v1053_v14 = vld [vmem:[#allocation2 + $0xe0] sm:$0xff]   ;;  %v1057_v18 = vld [vmem:[#allocation2 + $0xd8] sm:$0xff]   ;;  %v1060_v21 = vld [vmem:[#allocation2 + $0x10] sm:$0xff]  }
  0x15   :  { %930 = vmatprep.subr.bf16.mxu0 %v1047_v8  ;;  %v1054_v15 = vld [vmem:[#allocation2 + $0xa0] sm:$0xff]   ;;  %v1058_v19 = vld [vmem:[#allocation2 + $0x98] sm:$0xff]   ;;  %v1061_v22 = vld [vmem:[#allocation2 + $0xd0] sm:$0xff]  }
  0x16   :  { %951 = vmatpush3.bf16.msra.mxu1 %v1046_v7  ;;  %v1062_v26 = vld [vmem:[#allocation2 + $0x90] sm:$0xff]   ;;  %v1063_v27 = vld [vmem:[#allocation2 + $0x48] sm:$0xff]   ;;  %v1067_v33 = vld [vmem:[#allocation2 + $0x40] sm:$0xff]  }
  0x17   :  { %952 = vmatprep.subr.bf16.mxu1 %v1049_v10  ;;  %v1064_v28 = vld [vmem:[#allocation2 + $0x8] sm:$0xff]   ;;  %v1068_v34 = vld [vmem:[#allocation2] sm:$0xff]   ;;  %v1075_v42 = vld [vmem:[#allocation2 + $0x178] sm:$0xff]  }
  0x18   :  { %931 = vmatpush3.bf16.msra.mxu0 %v1048_v9  ;;  %v1065_v29 = vld [vmem:[#allocation2 + $0xc8] sm:$0xff]   ;;  %v1069_v35 = vld [vmem:[#allocation2 + $0xc0] sm:$0xff]   ;;  %v1078_v52 = vld [vmem:[#allocation2 + $0x138] sm:$0xff]  }
  0x19   :  { %932 = vmatprep.subr.bf16.mxu0 %v1051_v12  ;;  %v1066_v32 = vld [vmem:[#allocation2 + $0x88] sm:$0xff]   ;;  %v1074_v39 = vld [vmem:[#allocation2 + $0x80] sm:$0xff]   ;;  %v1079_v55 = vld [vmem:[#allocation2 + $0x170] sm:$0xff]  }
  0x1a   :  { %953 = vmatpush3.bf16.msra.mxu1 %v1050_v11  ;;  %v1070_v37 = vld [vmem:[%s1279_s0] ss:$14 sps:$4 sm:$0xff]   ;;  %v1072_v38 = vld [vmem:[%s1279_s0 + $0x1c] ss:$14 sps:$4 sm:$0xff]   ;;  %v1076_v43 = vld [vmem:[%s1279_s0 + $0x4] ss:$14 sps:$4 sm:$0xff]  }
  0x1b   :  { %954 = vmatprep.subr.bf16.mxu1 %v1053_v14  ;;  %v62_v40 = vrot.slane %v1070_v37, %v1198_v36  ;;  %v76_v41 = vrot.slane %v1072_v38, %v1198_v36  ;;  %v1077_v44 = vld [vmem:[%s1279_s0 + $0x20] ss:$14 sps:$4 sm:$0xff]   ;;  %v69_v48 = vrot.slane %v1076_v43, %v1198_v36  ;;  %v1085_v63 = vld [vmem:[#allocation2 + $0x158] sm:$0xff]   ;;  %v1097_v5 = vld [vmem:[%s1279_s0 + $0x24] ss:$14 sps:$4 sm:$0xff]  }
  0x1c   :  { %933 = vmatpush3.bf16.msra.mxu0 %v1052_v13  ;;  %v83_v49 = vrot.slane %v1077_v44, %v1198_v36  ;;  %v1080_v58 = vld [vmem:[#allocation2 + $0x130] sm:$0xff]   ;;  %v1081_v59 = vld [vmem:[#allocation2 + $0x168] sm:$0xff]   ;;  %v1083_v61 = vld [vmem:[#allocation2 + $0x160] sm:$0xff]   ;;  %v112_v10 = vrot.slane %v1097_v5, %v1198_v36 }
  0x1d   :  { %934 = vmatprep.subr.bf16.mxu0 %v1055_v16  ;;  %v85_v45 = vcombine.high %v62_v40, %v76_v41  ;;  %v84_v46 = vcombine.low %v62_v40, %v76_v41  ;;  %v1082_v60 = vld [vmem:[#allocation2 + $0x128] sm:$0xff]   ;;  %v1084_v62 = vld [vmem:[#allocation2 + $0x120] sm:$0xff]   ;;  %v1086_v1 = vld [vmem:[#allocation2 + $0x118] sm:$0xff]  }
  0x1e   :  { %955 = vmatpush3.bf16.msra.mxu1 %v1054_v15  ;;  %v87_v53 = vcombine.high %v69_v48, %v83_v49  ;;  %v86_v54 = vcombine.low %v69_v48, %v83_v49  ;;  %v1093_v0 = vld [vmem:[#allocation2 + $0x180] sm:$0xff]   ;;  %v1094_v2 = vld [vmem:[%s1279_s0 + $0x8] ss:$14 sps:$4 sm:$0xff]   ;;  %v1096_v3 = vld [vmem:[%s1279_s0 + $0xc] ss:$14 sps:$4 sm:$0x33]  }
  0x1f   :  { %956 = vmatprep.subr.bf16.mxu1 %v1057_v18  ;;  %v131_v50 = vpack.c.bf16 %v85_v45, %v85_v45  ;;  %v130_v51 = vpack.c.bf16 %v84_v46, %v84_v46  ;;  %v1087_v4 = vld [vmem:[#allocation2 + $0x150] sm:$0xff]   ;;  %v98_v7 = vrot.slane %v1094_v2, %v1198_v36  ;;  %v105_v8 = vrot.slane %v1096_v3, %v1198_v36  ;;  %v1089_v12 = vld [vmem:[#allocation2 + $0x148] sm:$0xff]   ;;  %v1091_v18 = vld [vmem:[#allocation2 + $0x140] sm:$0xff]  }
  0x20   :  { %935 = vmatpush3.bf16.msra.mxu0 %v1056_v17  ;;  %v133_v56 = vpack.c.bf16 %v87_v53, %v87_v53  ;;  %v132_v57 = vpack.c.bf16 %v86_v54, %v86_v54  ;;  %v1099_v6 = vld [vmem:[%s1279_s0 + $0x28] ss:$14 sps:$4 sm:$0x33]   ;;  %v1103_v25 = vld [vmem:[%s1282_s3 + $0x20] sm:$0xff]  }
  0x21   :  { %936 = vmatprep.subr.bf16.mxu0 %v1059_v20  ;;  %572 = vmatprep.mubr.bf16.mxu0 %v131_v50  ;;  %v1088_v9 = vld [vmem:[#allocation2 + $0x110] sm:$0xff]   ;;  %v119_v11 = vrot.slane %v1099_v6, %v1198_v36  ;;  %v121_v13 = vcombine.high %v98_v7, %v112_v10  ;;  %v1090_v17 = vld [vmem:[#allocation2 + $0x108] sm:$0xff]   ;;  %v1092_v20 = vld [vmem:[#allocation2 + $0x100] sm:$0xff]  }
  0x22   :  { %957 = vmatpush3.bf16.msra.mxu1 %v1058_v19  ;;  %612 = vmatprep.mubr.bf16.mxu1 %v133_v56  ;;  %v120_v19 = vcombine.low %v98_v7, %v112_v10  ;;  %v1101_v23 = vld [vmem:[%s1282_s3 + $0x30] sm:$0xff]   ;;  %v1102_v24 = vld [vmem:[%s1282_s3 + $0x28] sm:$0xff]   ;;  %v864_v43 = vld [vmem:[%s1281_s2] ss:$0 sm:$0xff] }
  0x23   :  { %958 = vmatprep.subr.bf16.mxu1 %v1061_v22  ;;  %v122_v14 = vcombine.low %v105_v8, %v119_v11  ;;  %v135_v15 = vpack.c.bf16 %v121_v13, %v121_v13  ;;  %v1100_v22 = vld [vmem:[%s1282_s3 + $0x38] sm:$0xff]  }
  0x24   :  { %937 = vmatpush3.bf16.msra.mxu0 %v1060_v21  ;;  %v134_v21 = vpack.c.bf16 %v120_v19, %v120_v19 }
  0x25   :  { %938 = vmatprep.subr.bf16.mxu0 %v1063_v27  ;;  %v136_v16 = vpack.c.bf16 %v122_v14, %v122_v14  ;;  %v1105_v27 = vld [vmem:[%s1282_s3 + $0x10] sm:$0xff]  }
  0x26   :  { %959 = vmatpush3.bf16.msra.mxu1 %v1062_v26  ;;  %v1104_v26 = vld [vmem:[%s1282_s3 + $0x18] sm:$0xff]  }
  0x27   :  { %960 = vmatprep.subr.bf16.mxu1 %v1065_v29  ;;  %v1107_v29 = vld [vmem:[%s1282_s3] sm:$0xff]  }
  0x28   :  { %939 = vmatpush3.bf16.msra.mxu0 %v1064_v28  ;;  %v1106_v28 = vld [vmem:[%s1282_s3 + $0x8] sm:$0xff]  }
  0x29   :  { %940 = vmatprep.subr.bf16.mxu0 %v1067_v33 }
  0x2a   :  { %961 = vmatpush3.bf16.msra.mxu1 %v1066_v32 }
  0x2b   :  { %962 = vmatprep.subr.bf16.mxu1 %v1069_v35 }
  0x2c   :  { %941 = vmatpush3.bf16.msra.mxu0 %v1068_v34 }
  0x2d   :  { %970 = vmatprep.subr.bf16.mxu0 %v1075_v42 }
  0x2e   :  { %963 = vmatpush3.bf16.msra.mxu1 %v1074_v39 }
  0x2f   :  { %1003 = vmatprep.subr.bf16.mxu1 %v1156_v47  ;;  %573 = vmatmul.mubr.bf16.vlgmr.msra.gmra.mxu0 %v130_v51 }
  0x30   :  { %971 = vmatpush3.bf16.msra.mxu0 %v1078_v52  ;;  %652 = vmatprep.mubr.bf16.mxu0 %v135_v15 }
  0x31   :  { %972 = vmatprep.subr.bf16.mxu0 %v1079_v55  ;;  %613 = vmatmul.mubr.bf16.vlgmr.msra.gmra.mxu1 %v132_v57  ;;  %v1158_v57 = vmov 1966171168  }
  0x32   :  { %1005 = vmatprep.mubr.msk.bf16.mxu1 %vm1157_vm0, %v1156_v47  ;;  %1004 = vmatpush3.bf16.msra.mxu1 %v1093_v0 }
  0x33   :  { %1009 = vmatprep.subr.bf16.mxu1 %v1156_v47 }
  0x34   :  { %973 = vmatpush3.bf16.msra.mxu0 %v1080_v58  ;;  %v816_v58 = vunpack.c.l.s4 %v1158_v57 }
  0x35   :  { %974 = vmatprep.subr.bf16.mxu0 %v1081_v59 }
  0x36   :  { %v817_v59 = vunpack.c.0.s8 %v816_v58 }
  0x38   :  { %975 = vmatpush3.bf16.msra.mxu0 %v1082_v60  ;;  %v915_v60 = vld [vmem:[%s1283_s4] ss:$0 sm:$0xff] }
  0x39   :  { %976 = vmatprep.subr.bf16.mxu0 %v1083_v61  ;;  %1006 = vmatmul.mubr.msk.bf16.vlgmr.msra.gmra.mxu1 %vm536_vm1, %v136_v16 }
  0x3a   :  { %1025 = vmatprep.mubr.msk.bf16.mxu1 %vm1157_vm0, %v1156_v47  ;;  %1010 = vmatpush3.bf16.msra.mxu1 %v1100_v22 }
  0x3b   :  { %1011 = vmatprep.subr.bf16.mxu1 %v1156_v47 }
  0x3c   :  { %977 = vmatpush3.bf16.msra.mxu0 %v1084_v62 }
  0x3d   :  { %978 = vmatprep.subr.bf16.mxu0 %v1085_v63  ;;  %v820_v63 = vsub.s32 %v817_v59, %v1195_v31 }
  0x3e   :  { %1012 = vmatpush3.bf16.msra.mxu1 %v1101_v23 }
  0x3f   :  { %1013 = vmatprep.subr.bf16.mxu1 %v1156_v47 }
  0x40   :  { %979 = vmatpush3.bf16.msra.mxu0 %v1086_v1 }
  0x41   :  { %980 = vmatprep.subr.bf16.mxu0 %v1087_v4 }
  0x42   :  { %1014 = vmatpush3.bf16.msra.mxu1 %v1102_v24 }
  0x43   :  { %1015 = vmatprep.subr.bf16.mxu1 %v1156_v47 }
  0x44   :  { %981 = vmatpush3.bf16.msra.mxu0 %v1088_v9 }
  0x45   :  { %982 = vmatprep.subr.bf16.mxu0 %v1089_v12 }
  0x46   :  { %1016 = vmatpush3.bf16.msra.mxu1 %v1103_v25 }
  0x47   :  { %1017 = vmatprep.subr.bf16.mxu1 %v1156_v47 }
  0x48   :  { %983 = vmatpush3.bf16.msra.mxu0 %v1090_v17 }
  0x49   :  { %984 = vmatprep.subr.bf16.mxu0 %v1091_v18 }
  0x4a   :  { %1018 = vmatpush3.bf16.msra.mxu1 %v1104_v26 }
  0x4b   :  { %1019 = vmatprep.subr.bf16.mxu1 %v1156_v47 }
  0x4c   :  { %985 = vmatpush3.bf16.msra.mxu0 %v1092_v20 }
  0x4e   :  { %1020 = vmatpush3.bf16.msra.mxu1 %v1105_v27 }
  0x4f   :  { %653 = vmatmul.mubr.bf16.vlgmr.msra.gmra.mxu0 %v134_v21  ;;  %1021 = vmatprep.subr.bf16.mxu1 %v1156_v47 }
  0x52   :  { %1022 = vmatpush3.bf16.msra.mxu1 %v1106_v28 }
  0x53   :  { %1023 = vmatprep.subr.bf16.mxu1 %v1156_v47 }
  0x56   :  { %1024 = vmatpush3.bf16.msra.mxu1 %v1107_v29 }
  0xef   :  { %v942_v30 = vpop.f32.mrf.mxu0 }
  0xf1   :  { %v943_v32 = vpop.f32.mrf.mxu0  ;;  %v964_v33 = vpop.f32.mrf.mxu1 }
  0xf2   :  { %v944_v42 = vadd.f32 %v943_v32, %v942_v30 }
  0xf3   :  { %v945_v34 = vpop.f32.mrf.mxu0  ;;  %v965_v35 = vpop.f32.mrf.mxu1 }
  0xf4   :  { %v575_v45 = vadd.f32 %v944_v42, %v864_v43  ;;  %v966_v46 = vadd.f32 %v965_v35, %v964_v33 }
  0xf5   :  { %v946_v36 = vpop.f32.mrf.mxu0  ;;  %v967_v37 = vpop.f32.mrf.mxu1 }
  0xf6   :  { %v615_v49 = vadd.f32 %v966_v46, %v575_v45 }
  0xf7   :  { %v968_v38 = vpop.f32.mrf.mxu1 }
  0xf9   :  { %v694_v39 = vpop.f32.mrf.mxu1 }
  0xfb   :  { %v1007_v40 = vpop.f32.mrf.mxu1 }
  0xfd   :  { %v697_v41 = vpop.f32.mrf.mxu1 }
  0xff   :  { %v1008_v44 = vpop.f32.mrf.mxu1 }
 0x10f   :  { %v986_v47 = vpop.f32.mrf.mxu0 }
 0x111   :  { %v987_v48 = vpop.f32.mrf.mxu0 }
 0x112   :  { %v988_v50 = vadd.f32 %v987_v48, %v986_v47 }
 0x113   :  { %v989_v51 = vpop.f32.mrf.mxu0 }
 0x114   :  { %v655_v52 = vadd.f32 %v988_v50, %v615_v49 }
 0x115   :  { %v990_v53 = vpop.f32.mrf.mxu0 }
 0x116   :  { %v695_v54 = vadd.f32 %v694_v39, %v655_v52 }
 0x118   :  { %v700_v55 = vmax.f32 %v695_v54, 0.0 }
 0x11a   :  { %v701_v56 = vpack.c.bf16 %v700_v55, %v700_v55 }
 0x11c   :  { %1026 = vmatmul.mubr.bf16.vlgmr.msra.gmra.mxu1 %v701_v56 }
 0x1dc   :  { %v807_v61 = vpop.f32.mrf.mxu1 }
 0x1dd   :  { %v808_v62 = vadd.f32 %v915_v60, %v807_v61 }
 0x1de   :  { %v1027_v0 = vpop.f32.mrf.mxu1 }
 0x1df   :  { %v813_v1 = vpack.c.bf16 %v808_v62, %v808_v62 }
 0x1e0   :  { %v810_v2 = vpop.f32.mrf.mxu1 }
 0x1e1   :  { %v821_v3 = vrot.slane %v813_v1, %v820_v63 }
 0x1e2   :  { %v1028_v4 = vpop.f32.mrf.mxu1 }
 0x1e3   :  { %v822_v5 = vcombine.high %v821_v3, %v821_v3  ;;  %v829_v6 = vrot.slane %v821_v3, %v820_v63  ;;  %924 = vst.sshfl [vmem:[#allocation5] sm:$0x1 pattern:$0x73625140] %v821_v3 }
 0x1e5   :  { %v836_v7 = vrot.slane %v822_v5, %v820_v63  ;;  %v837_v8 = vcombine.high %v829_v6, %v829_v6  ;;  %925 = vst.sshfl [vmem:[#allocation5 + $0x1] sm:$0x1 pattern:$0x73625140] %v822_v5 }
 0x1e7   :  { %v838_v9 = vcombine.high %v836_v7, %v836_v7  ;;  %845 = vst [vmem:[#allocation5 + $0x2] sm:$0x1] %v837_v8 }
 0x1e9   :  { %846 = vst [vmem:[#allocation5 + $0x3] sm:$0x1] %v838_v9 }
 0x1ea   :  { %851 = vsyncadd [#allocation4], 48  ;;  %s1159_s2 = smov [#allocation5]  }
 0x1eb   :  { %s852_s4 = sshll.u32 %s1159_s2, 4  ;;  %s853_s4 = int_to_ptr.vmem [resolvable:$true] %s852_s4 }
 0x1ec   :  { %s1128_s7 = scalar_lea.vmem %s853_s4, 16  ;;  %s1132_s8 = scalar_lea.vmem %s853_s4, 64 }
 0x1ed   :  { %p1129_p5 = scmp.ne.s32.totalorder %s853_s4, %s1128_s7  ;;  %p1133_p6 = scmp.lt.s32.totalorder %s853_s4, %s853_s4 }
 0x1ee   :  { %p1134_p7 = scmp.lt.s32.totalorder %s1132_s8, %s1128_s7 }
 0x1f0   :  { %p1135_p8 = por %p1134_p7, %p1133_p6 }
 0x1f2   :  { %p1136_p9 = pnand %p1135_p8, %p1129_p5 }
 0x1f4   :  { %1139 = shalt.err (!%p1136_p9)
}
 0x1f5   :  { %s1160_s9 = smov 16   ;;  %s1161_s10 = smov 1  }
 0x1f6   :  { %858 = dma.vmem_to_hbm [thread:$0]  %s853_s4, 16, %s1284_s5, [#allocation4], %s1160_s9, %s1160_s9, %s1161_s10  }
 0x1f7   :  { %1150 = dma.done.wait [#allocation4], 64  }
 0x1f8   :  { %1151 = vsyncadd [#allocation4], 4294967232 }
 0x1f9   :  { %862 = vsyncpa [#allocation3], 1 }
 0x1fa   :  { %863 = vsyncpa [#allocation4], 1 }

</bundles_post_ra>
